<compile_context>
chip_gen: v7x
topology: tpu7x:2x2x1
jax: 0.10.0
libtpu: 0.0.40
codegen_flags: <defaults>
</compile_context>

<pallas_src>
import functools

import jax
import jax.numpy as jnp
from jax import lax
from jax.experimental import pallas as pl
from jax.experimental.pallas import tpu as pltpu

BN_EPS = 1e-5                 # PyTorch BatchNorm2d default eps
_LANE = 128
_MAX_LANES_PER_TILE = 16384   # sanity cap on the unrolled per-step chunk count


def _round_up(x, m):
    return (x + m - 1) // m * m


def _chip_budgets():
    """(per-x-buffer byte cap, vmem_limit_bytes), generation-gated."""
    vmem_cap = None
    try:
        vmem_cap = int(getattr(pltpu.get_tpu_info(), "vmem_capacity_bytes", 0)) or None
    except Exception:
        vmem_cap = None
    if vmem_cap is not None and vmem_cap >= 100 * 1024 * 1024:
        # v5e / v6e: 128 MiB physical VMEM -> big tiles, fewer grid steps.
        return 16 * 1024 * 1024, 64 * 1024 * 1024
    # v7x (64 MiB VMEM per TC) or unknown: stay conservative.
    return 12 * 1024 * 1024, 30 * 1024 * 1024


def _is_megacore():
    """Best-effort: does this device have 2 TensorCores (megacore)?"""
    try:
        kind = jax.devices()[0].device_kind.lower()
    except Exception:
        return False
    return ("v7" in kind) or ("v4" in kind) or ("v5p" in kind)


def _accumulate_tile(x_ref, acc_ref, gb, *, hw, thw, ragged):
    """Add this (TN, C, THW) tile into the lane-shaped (TN, C, 128) accumulator.

    gb is the *global* spatial block index (traced int32).  Pure VPU adds over
    128-lane chunks; the mask branch only runs for the ragged last tile.
    """

    def plain_chunk(j):
        return x_ref[:, :, j:j + _LANE].astype(jnp.float32)

    def run(chunk_fn):
        acc = acc_ref[...]
        for j in range(0, thw, _LANE):
            acc = acc + chunk_fn(j)
        acc_ref[...] = acc

    if not ragged:
        run(plain_chunk)
        return

    need_mask = (gb + 1) * thw > hw

    @pl.when(jnp.logical_not(need_mask))
    def _full():
        run(plain_chunk)

    @pl.when(need_mask)
    def _masked():
        base = gb * thw
        lane = lax.broadcasted_iota(jnp.int32, (1, 1, _LANE), 2)

        def masked_chunk(j):
            v = plain_chunk(j)
            return jnp.where(base + j + lane < hw, v, 0.0)

        run(masked_chunk)


def _bam_fused_kernel(x_ref, w1_ref, b1_ref, w2_ref, b2_ref, o_ref, acc_ref,
                      *, hw, thw, ragged):
    """grid = (batch_blocks, spatial_blocks); MLP fused into the last spatial step."""
    s = pl.program_id(1)

    @pl.when(s == 0)
    def _init():
        acc_ref[...] = jnp.zeros_like(acc_ref)

    _accumulate_tile(x_ref, acc_ref, s, hw=hw, thw=thw, ragged=ragged)

    @pl.when(s == pl.num_programs(1) - 1)
    def _finalize():
        # Single cross-lane reduce (cold path).  1/HW is folded into w1.
        pooled = jnp.sum(acc_ref[...], axis=-1)                       # (TN, C)
        h = jnp.dot(pooled, w1_ref[...],
                    preferred_element_type=jnp.float32) + b1_ref[...]
        h = jnp.maximum(h, 0.0)
        o_ref[...] = jnp.dot(h, w2_ref[...],
                             preferred_element_type=jnp.float32) + b2_ref[...]


def _bam_pool_split_kernel(x_ref, o_ref, acc_ref, *, hw, thw, half_s, ragged):
    """grid = (2, half spatial blocks); each half emits a partial pooled sum."""
    p = pl.program_id(0)
    s = pl.program_id(1)

    @pl.when(s == 0)
    def _init():
        acc_ref[...] = jnp.zeros_like(acc_ref)

    _accumulate_tile(x_ref, acc_ref, p * half_s + s, hw=hw, thw=thw, ragged=ragged)

    @pl.when(s == pl.num_programs(1) - 1)
    def _finalize():
        o_ref[0] = jnp.sum(acc_ref[...], axis=-1)                     # (TN, C)


def bam_channel_attention(x, w1, b1, gamma, beta, rmean, rvar, w2, b2,
                          *, thw_cap=None, split_spatial=None):
    """x: (N, C, H, W) float32 or bfloat16.  Returns attention (N, C, 1, 1) f32."""
    N, C, H, W = x.shape
    B = w1.shape[0]                            # bottleneck dim
    HW = H * W

    # --- activation dtype: stream bf16 as-is, everything else as f32 ---
    if x.dtype == jnp.bfloat16 or x.dtype == jnp.float32:
        xk = x
    else:
        xk = x.astype(jnp.float32)
    itemsize = jnp.dtype(xk.dtype).itemsize
    x_flat = xk.reshape(N, C, HW)              # contiguous merge -> no copy

    # --- fold eval-mode BatchNorm and 1/HW into conv1 (wrapper-side) ---
    gamma = jnp.asarray(gamma, jnp.float32)
    rvar = jnp.asarray(rvar, jnp.float32)
    rmean = jnp.asarray(rmean, jnp.float32)
    beta = jnp.asarray(beta, jnp.float32)
    scale = gamma * lax.rsqrt(rvar + BN_EPS)                            # (B,)
    w1_eff = (jnp.asarray(w1, jnp.float32).T * scale[None, :]) / float(HW)  # (C, B)
    b1_eff = ((jnp.asarray(b1, jnp.float32) - rmean) * scale + beta).reshape(1, B)
    w2t = jnp.asarray(w2, jnp.float32).T                                # (B, C)
    b2r = jnp.asarray(b2, jnp.float32).reshape(1, C)

    # --- tile selection (no padding of x; ragged tiles masked in-kernel) ---
    TN = N if N <= 8 else 8
    grid_n = -(-N // TN)

    per_buf_bytes, vmem_limit = _chip_budgets()
    hw_lane = _round_up(HW, _LANE)
    budget_lanes = max(_LANE, (per_buf_bytes // (TN * C * itemsize)) // _LANE * _LANE)
    THW = min(hw_lane, budget_lanes, _MAX_LANES_PER_TILE)
    if thw_cap is not None:
        THW = min(THW, max(_LANE, (int(thw_cap) // _LANE) * _LANE))
    THW = max(_LANE, THW)
    grid_s = -(-HW // THW)
    ragged = (HW % THW) != 0

    # --- megacore spatial split (only useful when batch has a single block) ---
    if split_spatial is None:
        split = _is_megacore() and grid_n == 1 and grid_s >= 2
    else:
        split = bool(split_spatial) and grid_n == 1 and grid_s >= 2

    cost = pl.CostEstimate(
        flops=N * C * HW + 4 * N * C * B,
        transcendentals=0,
        bytes_accessed=N * C * HW * itemsize + N * C * 4 + (2 * C * B + B + C) * 4,
    )
    cparams = pltpu.CompilerParams(
        dimension_semantics=("parallel", "arbitrary"),
        vmem_limit_bytes=vmem_limit,
    )

    if not split:
        kernel = functools.partial(_bam_fused_kernel, hw=HW, thw=THW, ragged=ragged)
        out = pl.pallas_call(
            kernel,
            out_shape=jax.ShapeDtypeStruct((N, C), jnp.float32),
            grid=(grid_n, grid_s),
            in_specs=[
                pl.BlockSpec((TN, C, THW), lambda n, s: (n, 0, s)),   # x tile
                pl.BlockSpec((C, B), lambda n, s: (0, 0)),            # w1^T (BN + 1/HW folded)
                pl.BlockSpec((1, B), lambda n, s: (0, 0)),            # b1 (BN folded)
                pl.BlockSpec((B, C), lambda n, s: (0, 0)),            # w2^T
                pl.BlockSpec((1, C), lambda n, s: (0, 0)),            # b2
            ],
            out_specs=pl.BlockSpec((TN, C), lambda n, s: (n, 0)),
            scratch_shapes=[pltpu.VMEM((TN, C, _LANE), jnp.float32)],
            compiler_params=cparams,
            cost_estimate=cost,
        )(x_flat, w1_eff, b1_eff, w2t, b2r)
        return out.reshape(N, C, 1, 1)

    # Split path: grid_n == 1 (TN == N). Two spatial halves in parallel; the
    # tiny MLP and the halves-combine run in the wrapper (cold, O(N*C)).
    half_s = -(-grid_s // 2)
    ragged_split = ragged or (2 * half_s != grid_s)
    kernel = functools.partial(_bam_pool_split_kernel, hw=HW, thw=THW,
                               half_s=half_s, ragged=ragged_split)
    parts = pl.pallas_call(
        kernel,
        out_shape=jax.ShapeDtypeStruct((2, N, C), jnp.float32),
        grid=(2, half_s),
        in_specs=[
            pl.BlockSpec(
                (TN, C, THW),
                lambda p, s: (0, 0, jnp.minimum(p * half_s + s, grid_s - 1))),
        ],
        out_specs=pl.BlockSpec((1, TN, C), lambda p, s: (p, 0, 0)),
        scratch_shapes=[pltpu.VMEM((TN, C, _LANE), jnp.float32)],
        compiler_params=cparams,
        cost_estimate=cost,
    )(x_flat)
    pooled_sum = parts[0] + parts[1]                                   # (N, C)
    h = jnp.maximum(pooled_sum @ w1_eff + b1_eff, 0.0)
    out = h @ w2t + b2r
    return out.reshape(N, C, 1, 1)


def _reference(x, w1, b1, gamma, beta, rmean, rvar, w2, b2):
    # Plain-JAX reference mirroring the PyTorch forward (BN in eval mode).
    pooled = jnp.mean(x, axis=(2, 3))                                  # (N, C)
    h = pooled @ w1.T + b1
    h = (h - rmean) / jnp.sqrt(rvar + BN_EPS) * gamma + beta
    h = jnp.maximum(h, 0.0)
    out = h @ w2.T + b2
    return out.reshape(x.shape[0], x.shape[1], 1, 1)


def _make_params(key, in_dim, bottleneck):
    kw1, kb1, kw2, kb2, kg, kb, km, kv = jax.random.split(key, 8)
    w1 = jax.random.normal(kw1, (bottleneck, in_dim), jnp.float32) * 0.1
    b1 = jax.random.normal(kb1, (bottleneck,), jnp.float32) * 0.1
    gamma = 1.0 + 0.1 * jax.random.normal(kg, (bottleneck,), jnp.float32)
    beta = 0.1 * jax.random.normal(kb, (bottleneck,), jnp.float32)
    rmean = 0.1 * jax.random.normal(km, (bottleneck,), jnp.float32)
    rvar = jnp.abs(1.0 + 0.1 * jax.random.normal(kv, (bottleneck,), jnp.float32))
    w2 = jax.random.normal(kw2, (in_dim, bottleneck), jnp.float32) * 0.1
    b2 = jax.random.normal(kb2, (in_dim,), jnp.float32) * 0.1
    return w1, b1, gamma, beta, rmean, rvar, w2, b2


if __name__ == "__main__":
    # Module config: in_dim=32, reduction_factor=16 -> bottleneck_dim=2
    in_dim, reduction = 32, 16
    bottleneck = in_dim // reduction

    key = jax.random.PRNGKey(0)
    kx1, kx2, kx3, kp = jax.random.split(key, 4)
    params = _make_params(kp, in_dim, bottleneck)

    # Case 1: small canonical shape, single spatial tile, fused path.
    N, H, W = 2, 16, 16
    x = jax.random.normal(kx1, (N, in_dim, H, W), jnp.float32)
    out = jax.block_until_ready(bam_channel_attention(x, *params))
    ref = _reference(x, *params)
    assert out.shape == (N, in_dim, 1, 1)
    assert jnp.allclose(out, ref, atol=1e-5, rtol=1e-5)

    # Case 2: multi-tile spatial accumulation + ragged spatial tile + ragged
    # batch block (N=10 with TN=8), no wrapper padding anywhere.
    N2, H2, W2 = 10, 15, 17                      # HW = 255
    x2 = jax.random.normal(kx2, (N2, in_dim, H2, W2), jnp.float32)
    out2 = jax.block_until_ready(
        bam_channel_attention(x2, *params, thw_cap=128, split_spatial=False))
    ref2 = _reference(x2, *params)
    assert out2.shape == (N2, in_dim, 1, 1)
    assert jnp.allclose(out2, ref2, atol=1e-5, rtol=1e-5)

    # Case 3: force the megacore spatial-split path (odd block count exercises
    # the clamped + fully-masked overrun block).
    N3, H3, W3 = 2, 15, 20                       # HW = 300 -> 3 blocks of 128
    x3 = jax.random.normal(kx3, (N3, in_dim, H3, W3), jnp.float32)
    out3 = jax.block_until_ready(
        bam_channel_attention(x3, *params, thw_cap=128, split_spatial=True))
    ref3 = _reference(x3, *params)
    assert out3.shape == (N3, in_dim, 1, 1)
    assert jnp.allclose(out3, ref3, atol=1e-5, rtol=1e-5)

    # Case 4: bf16 activations are streamed as bf16 and accumulated in f32.
    x4 = x.astype(jnp.bfloat16)
    out4 = jax.block_until_ready(bam_channel_attention(x4, *params, split_spatial=False))
    ref4 = _reference(x4.astype(jnp.float32), *params)
    assert jnp.allclose(out4, ref4, atol=1e-4, rtol=1e-4)

    print("KERNEL_OK")
</pallas_src>

<mosaic_0001>
module attributes {stable_mosaic.version = 11 : i64} {
  func.func @_bam_fused_kernel(%arg0: i32, %arg1: i32, %arg2: memref<2x32x256xf32, #tpu.memory_space<vmem>>, %arg3: memref<32x2xf32, #tpu.memory_space<vmem>>, %arg4: memref<1x2xf32, #tpu.memory_space<vmem>>, %arg5: memref<2x32xf32, #tpu.memory_space<vmem>>, %arg6: memref<1x32xf32, #tpu.memory_space<vmem>>, %arg7: memref<2x32xf32, #tpu.memory_space<vmem>>, %arg8: memref<2x32x128xf32, #tpu.memory_space<vmem>>) attributes {dimension_semantics = [#tpu.dimension_semantics<parallel>, #tpu.dimension_semantics<arbitrary>], iteration_bounds = array<i64: 1, 1>, scalar_prefetch = 0 : i64, scratch_operands = 1 : i64, tpu.core_type = #tpu.core_type<tc>, window_params = [{transform_indices = @transform_0, window_bounds = array<i64: 2, 32, 256>}, {pipeline_mode = #tpu.pipeline_mode<synchronous>, transform_indices = @transform_1, window_bounds = array<i64: 32, 2>}, {pipeline_mode = #tpu.pipeline_mode<synchronous>, transform_indices = @transform_2, window_bounds = array<i64: 1, 2>}, {pipeline_mode = #tpu.pipeline_mode<synchronous>, transform_indices = @transform_3, window_bounds = array<i64: 2, 32>}, {pipeline_mode = #tpu.pipeline_mode<synchronous>, transform_indices = @transform_4, window_bounds = array<i64: 1, 32>}, {transform_indices = @transform_5, window_bounds = array<i64: 2, 32>}]} {
    %c0_i32 = arith.constant 0 : i32
    %0 = arith.cmpi eq, %arg1, %c0_i32 : i32
    %1 = arith.extui %0 : i1 to i32
    %c0_i32_0 = arith.constant 0 : i32
    %2 = arith.cmpi ne, %1, %c0_i32_0 : i32
    scf.if %2 {
      %cst = arith.constant 0.000000e+00 : f32
      %12 = vector.broadcast %cst : f32 to vector<2x32x128xf32>
      %c0_13 = arith.constant 0 : index
      %c0_14 = arith.constant 0 : index
      %c0_15 = arith.constant 0 : index
      %13 = vector.load %arg8[%c0_13, %c0_14, %c0_15] : memref<2x32x128xf32, #tpu.memory_space<vmem>>, vector<2x32x128xf32>
      tpu.vector_store %arg8[%c0_13, %c0_14, %c0_15], %12 {strides = array<i32>} : memref<2x32x128xf32, #tpu.memory_space<vmem>>, vector<2x32x128xf32>,
    } else {
    }
    %c0 = arith.constant 0 : index
    %c0_1 = arith.constant 0 : index
    %c0_2 = arith.constant 0 : index
    %3 = vector.load %arg8[%c0, %c0_1, %c0_2] : memref<2x32x128xf32, #tpu.memory_space<vmem>>, vector<2x32x128xf32>
    %c0_3 = arith.constant 0 : index
    %c0_4 = arith.constant 0 : index
    %c0_5 = arith.constant 0 : index
    %4 = vector.load %arg2[%c0_3, %c0_4, %c0_5] : memref<2x32x256xf32, #tpu.memory_space<vmem>>, vector<2x32x128xf32>
    %5 = arith.addf %3, %4 : vector<2x32x128xf32>
    %c0_6 = arith.constant 0 : index
    %c0_7 = arith.constant 0 : index
    %c128 = arith.constant 128 : index
    %6 = vector.load %arg2[%c0_6, %c0_7, %c128] : memref<2x32x256xf32, #tpu.memory_space<vmem>>, vector<2x32x128xf32>
    %7 = arith.addf %5, %6 : vector<2x32x128xf32>
    %c0_8 = arith.constant 0 : index
    %c0_9 = arith.constant 0 : index
    %c0_10 = arith.constant 0 : index
    %8 = vector.load %arg8[%c0_8, %c0_9, %c0_10] : memref<2x32x128xf32, #tpu.memory_space<vmem>>, vector<2x32x128xf32>
    tpu.vector_store %arg8[%c0_8, %c0_9, %c0_10], %7 {strides = array<i32>} : memref<2x32x128xf32, #tpu.memory_space<vmem>>, vector<2x32x128xf32>,
    %c0_i32_11 = arith.constant 0 : i32
    %9 = arith.cmpi eq, %arg1, %c0_i32_11 : i32
    %10 = arith.extui %9 : i1 to i32
    %c0_i32_12 = arith.constant 0 : i32
    %11 = arith.cmpi ne, %10, %c0_i32_12 : i32
    scf.if %11 {
      %c0_13 = arith.constant 0 : index
      %c0_14 = arith.constant 0 : index
      %c0_15 = arith.constant 0 : index
      %12 = vector.load %arg8[%c0_13, %c0_14, %c0_15] : memref<2x32x128xf32, #tpu.memory_space<vmem>>, vector<2x32x128xf32>
      %cst = arith.constant dense<0.000000e+00> : vector<2x32xf32>
      %13 = vector.multi_reduction <add>, %12, %cst [2] : vector<2x32x128xf32> to vector<2x32xf32>
      %c0_16 = arith.constant 0 : index
      %c0_17 = arith.constant 0 : index
      %14 = vector.load %arg3[%c0_16, %c0_17] : memref<32x2xf32, #tpu.memory_space<vmem>>, vector<32x2xf32>
      %cst_18 = arith.constant dense<0.000000e+00> : vector<2x2xf32>
      %15 = tpu.matmul %13, %14, %cst_18 {dimension_numbers = #tpu.dot_dimension_numbers<[1], [0], [0], [1], [0, 0, 1, 1], [], []>} : vector<2x32xf32>, vector<32x2xf32>, vector<2x2xf32> -> vector<2x2xf32>
      %c0_19 = arith.constant 0 : index
      %c0_20 = arith.constant 0 : index
      %16 = vector.load %arg4[%c0_19, %c0_20] : memref<1x2xf32, #tpu.memory_space<vmem>>, vector<1x2xf32>
      %17 = vector.broadcast %16 : vector<1x2xf32> to vector<2x2xf32>
      %18 = arith.addf %15, %17 : vector<2x2xf32>
      %cst_21 = arith.constant 0.000000e+00 : f32
      %19 = vector.broadcast %cst_21 : f32 to vector<2x2xf32>
      %20 = arith.maximumf %18, %19 : vector<2x2xf32>
      %c0_22 = arith.constant 0 : index
      %c0_23 = arith.constant 0 : index
      %21 = vector.load %arg5[%c0_22, %c0_23] : memref<2x32xf32, #tpu.memory_space<vmem>>, vector<2x32xf32>
      %cst_24 = arith.constant dense<0.000000e+00> : vector<2x32xf32>
      %22 = tpu.matmul %20, %21, %cst_24 {dimension_numbers = #tpu.dot_dimension_numbers<[1], [0], [0], [1], [0, 0, 1, 1], [], []>} : vector<2x2xf32>, vector<2x32xf32>, vector<2x32xf32> -> vector<2x32xf32>
      %c0_25 = arith.constant 0 : index
      %c0_26 = arith.constant 0 : index
      %23 = vector.load %arg6[%c0_25, %c0_26] : memref<1x32xf32, #tpu.memory_space<vmem>>, vector<1x32xf32>
      %24 = vector.broadcast %23 : vector<1x32xf32> to vector<2x32xf32>
      %25 = arith.addf %22, %24 : vector<2x32xf32>
      %c0_27 = arith.constant 0 : index
      %c0_28 = arith.constant 0 : index
      %26 = vector.load %arg7[%c0_27, %c0_28] : memref<2x32xf32, #tpu.memory_space<vmem>>, vector<2x32xf32>
      tpu.vector_store %arg7[%c0_27, %c0_28], %25 {strides = array<i32>} : memref<2x32xf32, #tpu.memory_space<vmem>>, vector<2x32xf32>,
    } else {
    }
    return
  }
  func.func @transform_0(%arg0: i32, %arg1: i32) -> (i32, i32, i32) {
    %c0_i32 = arith.constant 0 : i32
    %c0_i32_0 = arith.constant 0 : i32
    return %arg0, %c0_i32, %arg1 : i32, i32, i32
  }
  func.func @transform_1(%arg0: i32, %arg1: i32) -> (i32, i32) {
    %c0_i32 = arith.constant 0 : i32
    %c0_i32_0 = arith.constant 0 : i32
    %c0_i32_1 = arith.constant 0 : i32
    return %c0_i32, %c0_i32_0 : i32, i32
  }
  func.func @transform_2(%arg0: i32, %arg1: i32) -> (i32, i32) {
    %c0_i32 = arith.constant 0 : i32
    %c0_i32_0 = arith.constant 0 : i32
    %c0_i32_1 = arith.constant 0 : i32
    return %c0_i32, %c0_i32_0 : i32, i32
  }
  func.func @transform_3(%arg0: i32, %arg1: i32) -> (i32, i32) {
    %c0_i32 = arith.constant 0 : i32
    %c0_i32_0 = arith.constant 0 : i32
    %c0_i32_1 = arith.constant 0 : i32
    return %c0_i32, %c0_i32_0 : i32, i32
  }
  func.func @transform_4(%arg0: i32, %arg1: i32) -> (i32, i32) {
    %c0_i32 = arith.constant 0 : i32
    %c0_i32_0 = arith.constant 0 : i32
    %c0_i32_1 = arith.constant 0 : i32
    return %c0_i32, %c0_i32_0 : i32, i32
  }
  func.func @transform_5(%arg0: i32, %arg1: i32) -> (i32, i32) {
    %c0_i32 = arith.constant 0 : i32
    %c0_i32_0 = arith.constant 0 : i32
    return %arg0, %c0_i32 : i32, i32
  }
}

</mosaic_0001>

<bundles_post_ra>
// kernel: tpu_custom_call.1
= control target key start
LH: loop header
LB: loop body
LE: loop exit
PB: predicated region body
PF: predicated region fallthrough
CT: control target
= control target key end

     0   :  { %10 = vsyncpa [#allocation4], 0  ;;  %s537_s0 = inlined_call_operand.hbm [shape: f32[2,32,256], index: 0, kind: input, shape index: {}]   ;;  %s538_s1 = inlined_call_operand.vmem [shape: f32[32,2], index: 1, kind: input, shape index: {}]   ;;  %s539_s2 = inlined_call_operand.vmem [shape: f32[1,2], index: 2, kind: input, shape index: {}]   ;;  %s540_s3 = inlined_call_operand.vmem [shape: f32[2,32], index: 3, kind: input, shape index: {}]   ;;  %s541_s4 = inlined_call_operand.vmem [shape: f32[1,32], index: 4, kind: input, shape index: {}]   ;;  %s542_s5 = inlined_call_operand.hbm [shape: f32[2,32], index: 5, kind: output, shape index: {}]  }
   0x1   :  { %11 = vsyncpa [#allocation5], 0  ;;  %s455_s18 = smov [#allocation3]   ;;  %s407_s22 = scalar_lea.hbm %s537_s0, 2048 }
   0x2   :  { %s17_s19 = sshll.u32 %s455_s18, 4  ;;  %p408_p0 = scmp.ne.s32.totalorder %s537_s0, %s407_s22  ;;  %s18_s19 = int_to_ptr.vmem [resolvable:$true] %s17_s19 }
   0x3   :  { %p411_p1 = scmp.lt.u32.totalorder %s407_s22, %s537_s0 }
   0x5   :  { %p413_p2 = pnand %p411_p1, %p408_p0 }
   0x7   :  { %416 = shalt.err (!%p413_p2)
}
   0x8   :  { %s417_s27 = scalar_lea.vmem %s18_s19, 2048  ;;  %p422_p4 = scmp.lt.s32.totalorder %s18_s19, %s18_s19 }
   0x9   :  { %p418_p3 = scmp.ne.s32.totalorder %s18_s19, %s417_s27  ;;  %p423_p5 = scmp.lt.s32.totalorder %s417_s27, %s417_s27 }
   0xb   :  { %p424_p6 = por %p423_p5, %p422_p4 }
   0xd   :  { %p425_p7 = pnand %p424_p6, %p418_p3 }
   0xf   :  { %428 = shalt.err (!%p425_p7)
}
  0x10   :  { %s456_s28 = smov 256   ;;  %s457_s29 = smov 16  }
  0x11   :  { %23 = dma.hbm_to_vmem [thread:$0]  %s537_s0, 2048, %s18_s19, [#allocation4], %s456_s28, %s456_s28, %s457_s29  }
  0x12   :  { %451 = dma.done.wait [#allocation4], 2048  }
  0x13   :  { %452 = vsyncadd [#allocation4], 4294965248  ;;  %v59_v0 = vld [vmem:[#allocation3 + $0x40] sm:$0xff]  ;;  %v75_v1 = vld [vmem:[#allocation3 + $0x48] sm:$0xff]  ;;  %v458_v27 = vmov 0.0|0.0   ;;  %vm459_vm0 = vmmov 0   ;;  %v141_v32 = vlaneseq }
  0x14   :  { %v55_v2 = vld [vmem:[#allocation3] sm:$0xff]  ;;  %v83_v3 = vadd.f32 %v75_v1, %v59_v0  ;;  %v71_v4 = vld [vmem:[#allocation3 + $0x8] sm:$0xff]  ;;  %v60_v5 = vld [vmem:[#allocation3 + $0x50] sm:$0xff]  ;;  %394 = vmatprep.subr.bf16.mxu0 %v458_v27  ;;  %v460_v31 = vmov 0.0   ;;  %vm152_vm1 = vcmask 130112   ;;  %vm159_vm2 = vcmask 195712  }
  0x15   :  { %v76_v6 = vld [vmem:[#allocation3 + $0x58] sm:$0xff]  ;;  %v79_v7 = vadd.f32 %v71_v4, %v55_v2  ;;  %v56_v8 = vld [vmem:[#allocation3 + $0x10] sm:$0xff]  ;;  %v61_v12 = vld [vmem:[#allocation3 + $0x60] sm:$0xff]  ;;  %386 = vmatprep.mubr.msk.f32.mxu0 %vm459_vm0, %v460_v31  ;;  %389 = vmatprep.subr.mxu1 %v460_v31  ;;  %v142_v33 = vand.u32 127, %v141_v32  ;;  %v144_v38 = vshrl.u32 %v141_v32, 7  ;;  %vm166_vm3 = vcmask 261312  }
  0x16   :  { %v72_v9 = vld [vmem:[#allocation3 + $0x18] sm:$0xff]  ;;  %114 = vadd.xlane.f32.xlu1 %v83_v3  ;;  %v84_v10 = vadd.f32 %v76_v6, %v60_v5  ;;  %v77_v13 = vld [vmem:[#allocation3 + $0x68] sm:$0xff]  ;;  %v57_v14 = vld [vmem:[#allocation3 + $0x20] sm:$0xff]  ;;  %391 = vmatprep.mubr.msk.f32.mxu1 %vm459_vm0, %v460_v31  ;;  %vm187_vm4 = vcmask 1041409   ;;  %vm189_vm5 = vcmask 261120   ;;  %vm275_vm6 = vcmask 1041408  }
  0x17   :  { %106 = vadd.xlane.f32.xlu0 %v79_v7  ;;  %v80_v11 = vadd.f32 %v72_v9, %v56_v8  ;;  %v73_v15 = vld [vmem:[#allocation3 + $0x28] sm:$0xff]  ;;  %v85_v16 = vadd.f32 %v77_v13, %v61_v12  ;;  %v62_v18 = vld [vmem:[#allocation3 + $0x70] sm:$0xff]  ;;  %v78_v19 = vld [vmem:[#allocation3 + $0x78] sm:$0xff]  ;;  %v147_v36 = vadd.s32 4294967288, %v142_v33  ;;  %v154_v37 = vadd.s32 4294967280, %v142_v33  ;;  %s461_s19 = smov [#allocation6]  }
  0x18   :  { %v81_v17 = vadd.f32 %v73_v15, %v57_v14  ;;  %v58_v20 = vld [vmem:[#allocation3 + $0x30] sm:$0xff]  ;;  %v74_v21 = vld [vmem:[#allocation3 + $0x38] sm:$0xff]  ;;  %v86_v22 = vadd.f32 %v78_v19, %v62_v18  ;;  %v122_v24 = vld [vmem:[%s538_s1] sm:$0xff]  ;;  %v161_v42 = vadd.s32 4294967272, %v142_v33  ;;  %v145_v44 = vsub.s32 %v142_v33, %v144_v38  ;;  %s357_s20 = sshll.u32 %s461_s19, 4  ;;  %s358_s20 = int_to_ptr.vmem [resolvable:$true] %s357_s20 }
  0x19   :  { %v82_v23 = vadd.f32 %v74_v21, %v58_v20  ;;  %v123_v25 = vld [vmem:[%s538_s1 + $0x8] sm:$0xff]  ;;  %v124_v28 = vld [vmem:[%s538_s1 + $0x10] sm:$0xff]  ;;  %v125_v29 = vld [vmem:[%s538_s1 + $0x18] sm:$0xff]  ;;  %v150_v40 = vsub.s32 %v147_v36, %v144_v38  ;;  %v157_v43 = vsub.s32 %v154_v37, %v144_v38  ;;  %vm271_vm7 = vcmask 15360   ;;  %p434_p9 = scmp.lt.s32.totalorder %s358_s20, %s358_s20 }
  0x1a   :  { %116 = vadd.xlane.f32.xlu1 %v84_v10  ;;  %v395_v26 = vpack.c.bf16 %v123_v25, %v122_v24  ;;  %v398_v30 = vpack.c.bf16 %v125_v29, %v124_v28  ;;  %v164_v48 = vsub.s32 %v161_v42, %v144_v38  ;;  %v263_v1 = vld [vmem:[%s540_s3] sm:$0x3]  ;;  %vm349_vm8 = vcmask 254976   ;;  %s429_s3 = scalar_lea.vmem %s358_s20, 32 }
  0x1b   :  { %108 = vadd.xlane.f32.xlu0 %v80_v11  ;;  %390 = vmatpush3.msk.msra.mxu1 %vm275_vm6, %v263_v1  ;;  %v366_v2 = vld [vmem:[%s539_s2] ss:$0 sm:$0xff]  ;;  %p430_p8 = scmp.ne.s32.totalorder %s358_s20, %s429_s3  ;;  %p435_p10 = scmp.lt.s32.totalorder %s429_s3, %s429_s3 }
  0x1c   :  { %396 = vmatpush3.bf16.msra.mxu0 %v395_v26  ;;  %v368_v7 = vld [vmem:[%s541_s4] ss:$0 sm:$0xff] }
  0x1d   :  { %397 = vmatprep.subr.bf16.mxu0 %v458_v27  ;;  %p436_p11 = por %p435_p10, %p434_p9 }
  0x1e   :  { %118 = vadd.xlane.f32.xlu1 %v85_v16 }
  0x1f   :  { %110 = vadd.xlane.f32.xlu0 %v81_v17  ;;  %p437_p12 = pnand %p436_p11, %p430_p8 }
  0x20   :  { %399 = vmatpush3.bf16.msra.mxu0 %v398_v30 }
  0x22   :  { %120 = vadd.xlane.f32.xlu1 %v86_v22 }
  0x23   :  { %112 = vadd.xlane.f32.xlu0 %v82_v23 }
  0xa3   :  { %v115_v34 = vpop.xlane.xlu1 %114 }
  0xa4   :  { %v107_v35 = vpop.xlane.xlu0 %106  ;;  %v171_v51 = vrot.slane %v115_v34, %v145_v44 }
  0xa5   :  { %v146_v53 = vrot.slane %v107_v35, %v145_v44 }
  0xa7   :  { %v117_v39 = vpop.xlane.xlu1 %116 }
  0xa8   :  { %v109_v41 = vpop.xlane.xlu0 %108  ;;  %v175_v46 = vrot.slane %v117_v39, %v150_v40 }
  0xa9   :  { %v151_v49 = vrot.slane %v109_v41, %v150_v40 }
  0xaa   :  { %v176_v55 = vsel %vm152_vm1, %v175_v46, %v171_v51 }
  0xab   :  { %v119_v45 = vpop.xlane.xlu1 %118  ;;  %v153_v58 = vsel %vm152_vm1, %v151_v49, %v146_v53 }
  0xac   :  { %v111_v47 = vpop.xlane.xlu0 %110  ;;  %v180_v50 = vrot.slane %v119_v45, %v157_v43 }
  0xad   :  { %v158_v52 = vrot.slane %v111_v47, %v157_v43 }
  0xae   :  { %v181_v59 = vsel %vm159_vm2, %v180_v50, %v176_v55 }
  0xaf   :  { %v121_v54 = vpop.xlane.xlu1 %120  ;;  %v160_v61 = vsel %vm159_vm2, %v158_v52, %v153_v58 }
  0xb0   :  { %v185_v56 = vrot.slane %v121_v54, %v164_v48  ;;  %v113_v57 = vpop.xlane.xlu0 %112 }
  0xb1   :  { %v165_v60 = vrot.slane %v113_v57, %v164_v48 }
  0xb2   :  { %v186_v62 = vsel %vm166_vm3, %v185_v56, %v181_v59 }
  0xb3   :  { %v167_v63 = vsel %vm166_vm3, %v165_v60, %v160_v61 }
  0xb4   :  { %v188_v0 = vsel %vm187_vm4, %v186_v62, %v167_v63 }
  0xb5   :  { %387 = vmatmul.mubr.msk.f32.vlgmr.msra.gmra.mrb[0].mxu0 %vm189_vm5, %v188_v0 }
 0x188   :  { %v258_v3 = vpop.f32.mrb[0].mxu0 }
 0x189   :  { %v259_v4 = vadd.f32 %v366_v2, %v258_v3  ;;  %v388_v5 = vpop.f32.mrb[1].mxu0 }
 0x18b   :  { %v262_v6 = vmax.f32 %v259_v4, 0.0 }
 0x18d   :  { %392 = vmatmul.mubr.msk.f32.vlgmr.msra.gmra.mrb[0].mxu1 %vm271_vm7, %v262_v6 }
 0x260   :  { %v345_v8 = vpop.f32.mrb[0].mxu1 }
 0x261   :  { %v346_v9 = vadd.f32 %v368_v7, %v345_v8  ;;  %v393_v10 = vpop.f32.mrb[1].mxu1 }
 0x263   :  { %350 = vst.msk [vmem:[#allocation6] sm:$0x3] %vm349_vm8, %v346_v9 }
 0x264   :  { %440 = shalt.err (!%p437_p12)
}
 0x265   :  { %s441_s22 = scalar_lea.hbm %s542_s5, 32 }
 0x266   :  { %p442_p13 = scmp.ne.s32.totalorder %s542_s5, %s441_s22  ;;  %p445_p0 = scmp.lt.u32.totalorder %s441_s22, %s542_s5 }
 0x268   :  { %p447_p1 = pnand %p445_p0, %p442_p13 }
 0x26a   :  { %450 = shalt.err (!%p447_p1)
}
 0x26b   :  { %360 = dma.vmem_to_hbm [thread:$0]  %s358_s20, 32, %s542_s5, [#allocation5]  }
 0x26c   :  { %453 = dma.done.wait [#allocation5], 32  }
 0x26d   :  { %454 = vsyncadd [#allocation5], 4294967264 }
 0x26e   :  { %364 = vsyncpa [#allocation4], 1 }
 0x26f   :  { %365 = vsyncpa [#allocation5], 1 }

</bundles_post_ra>
